<compile_context>
chip_gen: v7x
topology: tpu7x:2x2x1
jax: 0.10.0
libtpu: 0.0.40
codegen_flags: <defaults>
</compile_context>

<pallas_src>
import functools

import jax
import jax.numpy as jnp
from jax import lax
from jax.experimental import pallas as pl
from jax.experimental.pallas import tpu as pltpu


def _round_up(x, m):
    return ((x + m - 1) // m) * m


# ---------------------------------------------------------------------------
# Kernels.  The output tile is stored transposed ((dim, patches)) so the final
# NCDHW layout is a plain reshape outside the kernel (no extra HBM pass).
# ---------------------------------------------------------------------------
def _mm_bias_kernel(p_ref, w_ref, b_ref, o_ref):
    """Single-shot (full-K) matmul + bias.

    The weight block index is constant over the whole grid, so Pallas fetches
    the weight from HBM exactly once and keeps it resident in VMEM.
    """
    res = jnp.dot(p_ref[0], w_ref[...], preferred_element_type=jnp.float32)
    res = res + b_ref[...]                        # (tm, tn) + (1, tn)
    o_ref[0] = res.T.astype(o_ref.dtype)          # transpose rides the XLU


def _mm_bias_acc_kernel(p_ref, w_ref, b_ref, o_ref, acc_ref):
    """K-tiled matmul + bias with an f32 VMEM accumulator (large-K fallback)."""
    k = pl.program_id(3)

    @pl.when(k == 0)
    def _():
        acc_ref[...] = jnp.zeros_like(acc_ref)

    acc_ref[...] += jnp.dot(p_ref[0], w_ref[...],
                            preferred_element_type=jnp.float32)

    @pl.when(k == pl.num_programs(3) - 1)
    def _():
        res = acc_ref[...] + b_ref[...]
        o_ref[0] = res.T.astype(o_ref.dtype)


# ---------------------------------------------------------------------------
# Generation-gated VMEM budgets (tile-selection budget, scoped-VMEM request).
# ---------------------------------------------------------------------------
def _vmem_config():
    try:
        cap = int(pltpu.get_tpu_info().vmem_capacity_bytes)
    except Exception:
        cap = 64 * 1024 * 1024                     # conservative (v7x-sized)
    if cap >= 100 * 1024 * 1024:                   # v5e / v6e class (128 MiB)
        return 100 * 1024 * 1024, 110 * 1024 * 1024
    return 36 * 1024 * 1024, 44 * 1024 * 1024      # v7x class (64 MiB)


_TM_TILES = (512, 384, 256, 128)


def _plan(S, K, N, in_itemsize, out_itemsize, budget):
    """Pick tiling for out[b, n, s] = sum_k patches[b, s, k] * w[k, n] + b[n]."""
    N_pad = _round_up(max(N, 128), 128)            # lane-dense, mult of 128

    def m_candidates():
        cands = []
        if S <= _TM_TILES[0]:
            cands.append(_round_up(S, 8))          # one tile covers all patches
        cands.extend(t for t in _TM_TILES if t < S)
        return cands

    def s_pad(tm):
        return tm if tm >= S else _round_up(S, tm)

    # --- preferred: collapse K (single MXU burst, weight resident in VMEM) --
    tn = N_pad
    for tm in m_candidates():
        need = (2 * tm * K * in_itemsize           # patches (double-buffered)
                + 2 * K * tn * in_itemsize         # weight (fetched once)
                + 2 * tn * 4                       # bias
                + 2 * tm * tn * out_itemsize)      # output (double-buffered)
        if need <= budget:
            return dict(kind="collapse", tm=tm, tn=tn, tk=K,
                        S_pad=s_pad(tm), K_pad=K, N_pad=N_pad)

    # --- fallback: stream K in the largest chunks that fit the budget -------
    tn_cands = [N_pad] + [t for t in (512, 256, 128)
                          if t < N_pad and N_pad % t == 0]
    for tn in tn_cands:
        for tm in m_candidates():
            fixed = 2 * tm * tn * out_itemsize + tm * tn * 4 + 2 * tn * 4
            per_tk = 2 * (tm + tn) * in_itemsize
            tk_fit = (budget - fixed) // per_tk
            tk_fit = (tk_fit // 128) * 128
            if tk_fit < 128:
                continue
            n_k = -(-K // min(tk_fit, K))          # ceil
            tk = _round_up(-(-K // n_k), 128)      # balanced 128-aligned chunks
            return dict(kind="ktiled", tm=tm, tn=tn, tk=tk,
                        S_pad=s_pad(tm), K_pad=n_k * tk, N_pad=N_pad)

    raise ValueError("could not find a PatchEmbed tiling that fits VMEM")


# ---------------------------------------------------------------------------
# Pallas wrapper: out[b, n, s] = sum_k patches[b, s, k] * weight[k, n] + bias[n]
# ---------------------------------------------------------------------------
def _patch_matmul(patches, weight, bias, out_dtype):
    B, S, K = patches.shape
    _, N = weight.shape
    in_itemsize = jnp.dtype(patches.dtype).itemsize
    out_itemsize = jnp.dtype(out_dtype).itemsize

    budget, vmem_limit = _vmem_config()
    p = _plan(S, K, N, in_itemsize, out_itemsize, budget)
    tm, tn, tk = p["tm"], p["tn"], p["tk"]
    S_pad, K_pad, N_pad = p["S_pad"], p["K_pad"], p["N_pad"]

    # zero-pad to tile multiples (no-op for already-aligned shapes)
    if (S_pad, K_pad) != (S, K):
        patches = jnp.pad(patches, ((0, 0), (0, S_pad - S), (0, K_pad - K)))
    if (K_pad, N_pad) != (K, N):
        weight = jnp.pad(weight, ((0, K_pad - K), (0, N_pad - N)))
    if N_pad != N:
        bias = jnp.pad(bias, (0, N_pad - N))
    bias2d = bias.reshape(1, N_pad).astype(jnp.float32)

    cost = pl.CostEstimate(
        flops=2 * B * S_pad * K_pad * N_pad,
        transcendentals=0,
        bytes_accessed=(in_itemsize * (B * S_pad * K_pad + K_pad * N_pad)
                        + out_itemsize * B * N_pad * S_pad),
    )

    if p["kind"] == "collapse":
        grid_spec = pltpu.PrefetchScalarGridSpec(
            num_scalar_prefetch=0,
            grid=(B, S_pad // tm),
            in_specs=[
                pl.BlockSpec((1, tm, K_pad), lambda b, i: (b, i, 0)),
                # constant block index: full weight DMA'd to VMEM exactly once
                pl.BlockSpec((K_pad, tn), lambda b, i: (0, 0)),
                pl.BlockSpec((1, tn), lambda b, i: (0, 0)),
            ],
            out_specs=pl.BlockSpec((1, tn, tm), lambda b, i: (b, 0, i)),
        )
        kernel = _mm_bias_kernel
        dim_sem = ("parallel", "parallel")
    else:
        grid_spec = pltpu.PrefetchScalarGridSpec(
            num_scalar_prefetch=0,
            grid=(B, S_pad // tm, N_pad // tn, K_pad // tk),
            in_specs=[
                pl.BlockSpec((1, tm, tk), lambda b, i, j, k: (b, i, k)),
                pl.BlockSpec((tk, tn), lambda b, i, j, k: (k, j)),
                pl.BlockSpec((1, tn), lambda b, i, j, k: (0, j)),
            ],
            out_specs=pl.BlockSpec((1, tn, tm), lambda b, i, j, k: (b, j, i)),
            scratch_shapes=[pltpu.VMEM((tm, tn), jnp.float32)],
        )
        kernel = _mm_bias_acc_kernel
        dim_sem = ("parallel", "parallel", "parallel", "arbitrary")

    out = pl.pallas_call(
        kernel,
        out_shape=jax.ShapeDtypeStruct((B, N_pad, S_pad), out_dtype),
        grid_spec=grid_spec,
        compiler_params=pltpu.CompilerParams(
            dimension_semantics=dim_sem,
            vmem_limit_bytes=vmem_limit,
            # let XLA fuse the im2col reshape/transpose into the patches
            # operand pipeline where possible (avoids an HBM round trip of
            # `patches`, which is roughly the size of x).
            allow_input_fusion=[True, False, False],
        ),
        cost_estimate=cost,
    )(patches, weight, bias2d)

    if (N_pad, S_pad) != (N, S):
        out = out[:, :N, :S]
    return out                                       # (B, N, S), channel-major


# ---------------------------------------------------------------------------
# Forward (jitted so glue reshapes can fuse with the pallas_call)
# ---------------------------------------------------------------------------
def _patch_embed_forward(x, weight, bias, fp, ip, compute_dtype):
    B, C, D, H, W = x.shape
    dim = weight.shape[0]
    nD, nH, nW = D // fp, H // ip, W // ip
    S = nD * nH * nW
    K = C * fp * ip * ip

    # im2col: pure reshape/transpose, inner order (c, kd, kh, kw).
    # TODO(synk): verify in compiled HLO that allow_input_fusion folds this
    # transpose into the pallas operand pipeline; otherwise move the gather
    # into the kernel via a multi-axis BlockSpec over (b, d, h) slabs.
    xp = x.reshape(B, C, nD, fp, nH, ip, nW, ip)
    xp = jnp.transpose(xp, (0, 2, 4, 6, 1, 3, 5, 7))   # (B,nD,nH,nW,C,fp,ip,ip)
    patches = xp.reshape(B, S, K)

    w2d = jnp.transpose(weight.reshape(dim, K))        # (K, dim)

    if compute_dtype is not None:                      # optional bf16 MXU path
        patches = patches.astype(compute_dtype)
        w2d = w2d.astype(compute_dtype)

    out = _patch_matmul(patches, w2d, bias, out_dtype=x.dtype)  # (B, dim, S)
    # channel-major kernel output -> NCDHW is a pure reshape (no HBM transpose)
    return out.reshape(B, dim, nD, nH, nW)


class PatchEmbed:
    """JAX/Pallas port of the PyTorch PatchEmbed module (Conv3d patchify)."""

    def __init__(self, img_size=160, frames=120, image_patch_size=16,
                 frame_patch_size=12, in_chans=3, dim=768, *, key=None,
                 compute_dtype=None):
        self.img_size = img_size
        self.frames = frames
        self.ip = image_patch_size
        self.fp = frame_patch_size
        self.in_chans = in_chans
        self.dim = dim
        if key is None:
            key = jax.random.PRNGKey(0)
        kw, kb = jax.random.split(key)
        # PyTorch Conv3d init: U(-1/sqrt(fan_in), 1/sqrt(fan_in))
        fan_in = in_chans * frame_patch_size * image_patch_size * image_patch_size
        bound = 1.0 / (fan_in ** 0.5)
        # PyTorch Conv3d weight shape: (dim, in_chans, fp, ip, ip)
        self.weight = jax.random.uniform(
            kw, (dim, in_chans, frame_patch_size, image_patch_size,
                 image_patch_size),
            dtype=jnp.float32, minval=-bound, maxval=bound)
        self.bias = jax.random.uniform(
            kb, (dim,), dtype=jnp.float32, minval=-bound, maxval=bound)
        self._fwd = jax.jit(functools.partial(
            _patch_embed_forward, fp=self.fp, ip=self.ip,
            compute_dtype=compute_dtype))

    def __call__(self, x):
        return self._fwd(x, self.weight, self.bias)


if __name__ == "__main__":
    key = jax.random.PRNGKey(0)
    k_x, k_p = jax.random.split(key)

    # small shapes consistent with the module's forward
    B, C, D, H, W = 2, 3, 8, 16, 16
    fp, ip, dim = 4, 8, 128
    x = jax.random.normal(k_x, (B, C, D, H, W), dtype=jnp.float32)

    model = PatchEmbed(img_size=16, frames=8, image_patch_size=ip,
                       frame_patch_size=fp, in_chans=C, dim=dim, key=k_p)

    out = jax.block_until_ready(model(x))

    # reference: plain XLA Conv3d (NCDHW, OIDHW), kernel == stride
    ref = lax.conv_general_dilated(
        x, model.weight,
        window_strides=(fp, ip, ip),
        padding="VALID",
        dimension_numbers=("NCDHW", "OIDHW", "NCDHW"),
    ) + model.bias.reshape(1, -1, 1, 1, 1)

    assert out.shape == (B, dim, D // fp, H // ip, W // ip), out.shape
    # tolerance covers the default TPU f32 matmul precision (bf16 MXU passes)
    # possibly differing between the conv reference and the Pallas matmul.
    err = float(jnp.max(jnp.abs(out - ref)))
    assert jnp.allclose(out, ref, atol=2e-2, rtol=2e-2), err
    print("KERNEL_OK")
</pallas_src>

<mosaic_0001>
module attributes {stable_mosaic.version = 11 : i64} {
  func.func @_mm_bias_kernel(%arg0: i32, %arg1: i32, %arg2: memref<1x8x768xf32, #tpu.memory_space<vmem>>, %arg3: memref<768x128xf32, #tpu.memory_space<vmem>>, %arg4: memref<1x128xf32, #tpu.memory_space<vmem>>, %arg5: memref<1x128x8xf32, #tpu.memory_space<vmem>>) attributes {dimension_semantics = [#tpu.dimension_semantics<parallel>, #tpu.dimension_semantics<parallel>], iteration_bounds = array<i64: 2, 1>, scalar_prefetch = 0 : i64, scratch_operands = 0 : i64, tpu.core_type = #tpu.core_type<tc>, window_params = [{transform_indices = @transform_0, window_bounds = array<i64: 1, 8, 768>}, {pipeline_mode = #tpu.pipeline_mode<synchronous>, transform_indices = @transform_1, window_bounds = array<i64: 768, 128>}, {pipeline_mode = #tpu.pipeline_mode<synchronous>, transform_indices = @transform_2, window_bounds = array<i64: 1, 128>}, {transform_indices = @transform_3, window_bounds = array<i64: 1, 128, 8>}]} {
    %c0 = arith.constant 0 : index
    %c0_0 = arith.constant 0 : index
    %c0_1 = arith.constant 0 : index
    %0 = vector.load %arg2[%c0, %c0_0, %c0_1] : memref<1x8x768xf32, #tpu.memory_space<vmem>>, vector<1x8x768xf32>
    %1 = vector.shape_cast %0 : vector<1x8x768xf32> to vector<8x768xf32>
    %c0_2 = arith.constant 0 : index
    %c0_3 = arith.constant 0 : index
    %2 = vector.load %arg3[%c0_2, %c0_3] : memref<768x128xf32, #tpu.memory_space<vmem>>, vector<768x128xf32>
    %cst = arith.constant dense<0.000000e+00> : vector<8x128xf32>
    %3 = tpu.matmul %1, %2, %cst {dimension_numbers = #tpu.dot_dimension_numbers<[1], [0], [0], [1], [0, 0, 1, 1], [], []>} : vector<8x768xf32>, vector<768x128xf32>, vector<8x128xf32> -> vector<8x128xf32>
    %c0_4 = arith.constant 0 : index
    %c0_5 = arith.constant 0 : index
    %4 = vector.load %arg4[%c0_4, %c0_5] : memref<1x128xf32, #tpu.memory_space<vmem>>, vector<1x128xf32>
    %5 = vector.broadcast %4 : vector<1x128xf32> to vector<8x128xf32>
    %6 = arith.addf %3, %5 : vector<8x128xf32>
    %7 = tpu.transpose %6, [1, 0] : vector<8x128xf32> -> vector<128x8xf32>
    %c0_6 = arith.constant 0 : index
    %c0_7 = arith.constant 0 : index
    %c0_8 = arith.constant 0 : index
    %8 = vector.load %arg5[%c0_6, %c0_7, %c0_8] : memref<1x128x8xf32, #tpu.memory_space<vmem>>, vector<1x128x8xf32>
    %9 = vector.shape_cast %8 : vector<1x128x8xf32> to vector<128x8xf32>
    %10 = vector.shape_cast %7 : vector<128x8xf32> to vector<1x128x8xf32>
    tpu.vector_store %arg5[%c0_6, %c0_7, %c0_8], %10 {strides = array<i32>} : memref<1x128x8xf32, #tpu.memory_space<vmem>>, vector<1x128x8xf32>,
    return
  }
  func.func @transform_0(%arg0: i32, %arg1: i32) -> (i32, i32, i32) {
    %c0_i32 = arith.constant 0 : i32
    %c0_i32_0 = arith.constant 0 : i32
    return %arg0, %arg1, %c0_i32 : i32, i32, i32
  }
  func.func @transform_1(%arg0: i32, %arg1: i32) -> (i32, i32) {
    %c0_i32 = arith.constant 0 : i32
    %c0_i32_0 = arith.constant 0 : i32
    %c0_i32_1 = arith.constant 0 : i32
    return %c0_i32, %c0_i32_0 : i32, i32
  }
  func.func @transform_2(%arg0: i32, %arg1: i32) -> (i32, i32) {
    %c0_i32 = arith.constant 0 : i32
    %c0_i32_0 = arith.constant 0 : i32
    %c0_i32_1 = arith.constant 0 : i32
    return %c0_i32, %c0_i32_0 : i32, i32
  }
  func.func @transform_3(%arg0: i32, %arg1: i32) -> (i32, i32, i32) {
    %c0_i32 = arith.constant 0 : i32
    %c0_i32_0 = arith.constant 0 : i32
    return %arg0, %c0_i32, %arg1 : i32, i32, i32
  }
}

</mosaic_0001>

<bundles_post_ra>
// kernel: _patch_embed_forward.1
= control target key start
LH: loop header
LB: loop body
LE: loop exit
PB: predicated region body
PF: predicated region fallthrough
CT: control target
= control target key end

     0   :  { %s942_s12 = smov 0   ;;  %s944_s13 = smov 0   ;;  %s1318_s0 = inlined_call_operand.vmem [shape: f32[2,8,768], index: 0, kind: input, shape index: {}]   ;;  %s1319_s1 = inlined_call_operand.vmem [shape: f32[768,128], index: 1, kind: input, shape index: {}]   ;;  %s1320_s2 = inlined_call_operand.vmem [shape: f32[1,128], index: 2, kind: input, shape index: {}]   ;;  %s1321_s3 = inlined_call_operand.vmem [shape: f32[2,128,8], index: 3, kind: output, shape index: {}]  }
   0x1   :  { %s946_s14 = smov 0  }
   0x2 LB: > { %s25_s15 = sadd.s32 1, %s916_s13  ;;  %p663_p0 = scmp.ge.s32.totalorder %s920_s14, 1  ;;  %s920_s14 = sphi %s946_s14, %s13_s14   ;;  %s916_s13 = sphi %s944_s13, %s1323_s13   ;;  %s912_s12 = sphi %s942_s12, %s1322_s12  }
   0x3   : > { %p27_p1 = scmp.ge.s32.totalorder %s25_s15, 2  ;;  %p157_p2 = scmp.lt.s32.totalorder %s920_s14, 3 }
   0x5   : > { %s1325_s15 = smov (%p27_p1, %s25_s15), 0  ;;  %p158_p3 = pnand %p663_p0, %p157_p2 }
   0x6   : > { %v227_v0 = vld [vmem:[%s1319_s1 + $0x80] sm:$0xff] (!%p158_p3)  ;;  %v228_v1 = vld [vmem:[%s1319_s1 + $0x88] sm:$0xff] (!%p158_p3)  ;;  %v229_v11 = vld [vmem:[%s1319_s1 + $0x90] sm:$0xff] (!%p158_p3)  ;;  %p188_p4 = scmp.lt.s32.totalorder (!%p158_p3), %s912_s12, 1  ;;  %vm556_vm0 = vcmask (!%p158_p3), 64512  }
   0x7   : > { %161 = sbr.rel (%p158_p3) target bundleno = 480 (0x1e0), region = 32  ;;  %v211_v2 = vld [vmem:[%s1319_s1] sm:$0xff] (!%p158_p3)  ;;  %v776_v3 = vpack.c.bf16 (!%p158_p3), %v228_v1, %v227_v0  ;;  %v212_v4 = vld [vmem:[%s1319_s1 + $0x8] sm:$0xff] (!%p158_p3)  ;;  %v230_v13 = vld [vmem:[%s1319_s1 + $0x98] sm:$0xff] (!%p158_p3) }
   0x8   : > { %v259_v5 = vld [vmem:[%s1319_s1 + $0x180] sm:$0xff] (!%p158_p3)  ;;  %v260_v6 = vld [vmem:[%s1319_s1 + $0x188] sm:$0xff] (!%p158_p3)  ;;  %v778_v7 = vpack.c.bf16 (!%p158_p3), %v212_v4, %v211_v2  ;;  %v213_v14 = vld [vmem:[%s1319_s1 + $0x10] sm:$0xff] (!%p158_p3)  ;;  %v780_v16 = vpack.c.bf16 (!%p158_p3), %v230_v13, %v229_v11 }
   0x9   : > { %v808_v8 = vpack.c.bf16 (!%p158_p3), %v260_v6, %v259_v5  ;;  %v243_v9 = vld [vmem:[%s1319_s1 + $0x100] sm:$0xff] (!%p158_p3)  ;;  %v244_v10 = vld [vmem:[%s1319_s1 + $0x108] sm:$0xff] (!%p158_p3)  ;;  %777 = vmatprep.subr.bf16.mxu0 (!%p158_p3), %v776_v3  ;;  %v214_v15 = vld [vmem:[%s1319_s1 + $0x18] sm:$0xff] (!%p158_p3) }
   0xa   : > { %v810_v12 = vpack.c.bf16 (!%p158_p3), %v244_v10, %v243_v9  ;;  %779 = vmatpush3.bf16.msra.mxu0 (!%p158_p3), %v778_v7  ;;  %v782_v17 = vpack.c.bf16 (!%p158_p3), %v214_v15, %v213_v14  ;;  %v261_v18 = vld [vmem:[%s1319_s1 + $0x190] sm:$0xff] (!%p158_p3)  ;;  %v262_v19 = vld [vmem:[%s1319_s1 + $0x198] sm:$0xff] (!%p158_p3)  ;;  %v231_v23 = vld [vmem:[%s1319_s1 + $0xa0] sm:$0xff] (!%p158_p3) }
   0xb   : > { %809 = vmatprep.subr.bf16.mxu1 (!%p158_p3), %v808_v8  ;;  %v245_v20 = vld [vmem:[%s1319_s1 + $0x110] sm:$0xff] (!%p158_p3)  ;;  %v812_v21 = vpack.c.bf16 (!%p158_p3), %v262_v19, %v261_v18  ;;  %v246_v22 = vld [vmem:[%s1319_s1 + $0x118] sm:$0xff] (!%p158_p3)  ;;  %v232_v24 = vld [vmem:[%s1319_s1 + $0xa8] sm:$0xff] (!%p158_p3)  ;;  %781 = vmatprep.subr.bf16.mxu0 (!%p158_p3), %v780_v16 }
   0xc   : > { %811 = vmatpush3.bf16.msra.mxu1 (!%p158_p3), %v810_v12  ;;  %v814_v25 = vpack.c.bf16 (!%p158_p3), %v246_v22, %v245_v20  ;;  %v784_v26 = vpack.c.bf16 (!%p158_p3), %v232_v24, %v231_v23  ;;  %v215_v27 = vld [vmem:[%s1319_s1 + $0x20] sm:$0xff] (!%p158_p3)  ;;  %v216_v28 = vld [vmem:[%s1319_s1 + $0x28] sm:$0xff] (!%p158_p3)  ;;  %v233_v35 = vld [vmem:[%s1319_s1 + $0xb0] sm:$0xff] (!%p158_p3) }
   0xd   : > { %v263_v29 = vld [vmem:[%s1319_s1 + $0x1a0] sm:$0xff] (!%p158_p3)  ;;  %813 = vmatprep.subr.bf16.mxu1 (!%p158_p3), %v812_v21  ;;  %v264_v30 = vld [vmem:[%s1319_s1 + $0x1a8] sm:$0xff] (!%p158_p3)  ;;  %v786_v33 = vpack.c.bf16 (!%p158_p3), %v216_v28, %v215_v27  ;;  %v234_v36 = vld [vmem:[%s1319_s1 + $0xb8] sm:$0xff] (!%p158_p3) }
   0xe   : > { %v247_v31 = vld [vmem:[%s1319_s1 + $0x120] sm:$0xff]  ;;  %v248_v32 = vld [vmem:[%s1319_s1 + $0x128] sm:$0xff]  ;;  %783 = vmatpush3.bf16.msra.mxu0 %v782_v17  ;;  %v816_v34 = vpack.c.bf16 %v264_v30, %v263_v29  ;;  %v217_v37 = vld [vmem:[%s1319_s1 + $0x30] sm:$0xff]  ;;  %v788_v39 = vpack.c.bf16 %v234_v36, %v233_v35  ;;  %s1327_s12 = smov (!%p188_p4, %s912_s12), 1 }
   0xf   : > { %785 = vmatprep.subr.bf16.mxu0 %v784_v26  ;;  %v818_v38 = vpack.c.bf16 %v248_v32, %v247_v31  ;;  %v218_v40 = vld [vmem:[%s1319_s1 + $0x38] sm:$0xff]  ;;  %v265_v41 = vld [vmem:[%s1319_s1 + $0x1b0] sm:$0xff]  ;;  %v235_v46 = vld [vmem:[%s1319_s1 + $0xc0] sm:$0xff]  ;;  %s872_s25 = smul.u32 48, %s1327_s12 }
  0x10   : > { %815 = vmatpush3.bf16.msra.mxu1 %v814_v25  ;;  %v266_v42 = vld [vmem:[%s1319_s1 + $0x1b8] sm:$0xff]  ;;  %v249_v44 = vld [vmem:[%s1319_s1 + $0x130] sm:$0xff]  ;;  %v236_v47 = vld [vmem:[%s1319_s1 + $0xc8] sm:$0xff]  ;;  %v790_v48 = vpack.c.bf16 %v218_v40, %v217_v37 }
  0x11   : > { %817 = vmatprep.subr.bf16.mxu1 %v816_v34  ;;  %v820_v43 = vpack.c.bf16 %v266_v42, %v265_v41  ;;  %v250_v45 = vld [vmem:[%s1319_s1 + $0x138] sm:$0xff]  ;;  %v267_v49 = vld [vmem:[%s1319_s1 + $0x1c0] sm:$0xff]  ;;  %v268_v50 = vld [vmem:[%s1319_s1 + $0x1c8] sm:$0xff]  ;;  %v792_v52 = vpack.c.bf16 %v236_v47, %v235_v46  ;;  %s1113_s21 = scalar_lea.vmem %s1318_s0, %s872_s25 }
  0x12   : > { %787 = vmatpush3.bf16.msra.mxu0 %v786_v33  ;;  %v822_v51 = vpack.c.bf16 %v250_v45, %v249_v44  ;;  %v219_v53 = vld [vmem:[%s1319_s1 + $0x40] sm:$0xff]  ;;  %v220_v54 = vld [vmem:[%s1319_s1 + $0x48] sm:$0xff]  ;;  %v824_v56 = vpack.c.bf16 %v268_v50, %v267_v49  ;;  %v237_v58 = vld [vmem:[%s1319_s1 + $0xd0] sm:$0xff] }
  0x13   : > { %789 = vmatprep.subr.bf16.mxu0 %v788_v39  ;;  %v251_v55 = vld [vmem:[%s1319_s1 + $0x140] sm:$0xff]  ;;  %v252_v57 = vld [vmem:[%s1319_s1 + $0x148] sm:$0xff]  ;;  %v238_v59 = vld [vmem:[%s1319_s1 + $0xd8] sm:$0xff]  ;;  %v794_v62 = vpack.c.bf16 %v220_v54, %v219_v53 }
  0x14   : > { %819 = vmatpush3.bf16.msra.mxu1 %v818_v38  ;;  %v269_v60 = vld [vmem:[%s1319_s1 + $0x1d0] sm:$0xff]  ;;  %v270_v61 = vld [vmem:[%s1319_s1 + $0x1d8] sm:$0xff]  ;;  %v826_v63 = vpack.c.bf16 %v252_v57, %v251_v55  ;;  %v796_v0 = vpack.c.bf16 %v238_v59, %v237_v58  ;;  %v239_v6 = vld [vmem:[%s1319_s1 + $0xe0] sm:$0xff] }
  0x15   : > { %821 = vmatprep.subr.bf16.mxu1 %v820_v43  ;;  %v221_v1 = vld [vmem:[%s1319_s1 + $0x50] sm:$0xff]  ;;  %v222_v2 = vld [vmem:[%s1319_s1 + $0x58] sm:$0xff]  ;;  %v828_v4 = vpack.c.bf16 %v270_v61, %v269_v60  ;;  %v240_v7 = vld [vmem:[%s1319_s1 + $0xe8] sm:$0xff] }
  0x16   : > { %791 = vmatpush3.bf16.msra.mxu0 %v790_v48  ;;  %v253_v3 = vld [vmem:[%s1319_s1 + $0x150] sm:$0xff]  ;;  %v254_v5 = vld [vmem:[%s1319_s1 + $0x158] sm:$0xff]  ;;  %v271_v8 = vld [vmem:[%s1319_s1 + $0x1e0] sm:$0xff]  ;;  %v798_v10 = vpack.c.bf16 %v222_v2, %v221_v1  ;;  %v800_v14 = vpack.c.bf16 %v240_v7, %v239_v6 }
  0x17   : > { %793 = vmatprep.subr.bf16.mxu0 %v792_v52  ;;  %v272_v9 = vld [vmem:[%s1319_s1 + $0x1e8] sm:$0xff]  ;;  %v223_v11 = vld [vmem:[%s1319_s1 + $0x60] sm:$0xff]  ;;  %v830_v13 = vpack.c.bf16 %v254_v5, %v253_v3  ;;  %v241_v19 = vld [vmem:[%s1319_s1 + $0xf0] sm:$0xff] }
  0x18   : > { %823 = vmatpush3.bf16.msra.mxu1 %v822_v51  ;;  %v206_v12 = vld [vmem:[%s1113_s21 + $0x8] sm:$0xff]  ;;  %v255_v16 = vld [vmem:[%s1319_s1 + $0x160] sm:$0xff]  ;;  %v832_v18 = vpack.c.bf16 %v272_v9, %v271_v8  ;;  %v242_v20 = vld [vmem:[%s1319_s1 + $0xf8] sm:$0xff] }
  0x19   : > { %825 = vmatprep.subr.bf16.mxu1 %v824_v56  ;;  %v224_v15 = vld [vmem:[%s1319_s1 + $0x68] sm:$0xff]  ;;  %378 = vmatprep.mubr.f32.mxu0 %v206_v12  ;;  %v208_v21 = vld [vmem:[%s1113_s21 + $0x18] sm:$0xff]  ;;  %v273_v22 = vld [vmem:[%s1319_s1 + $0x1f0] sm:$0xff]  ;;  %v804_v26 = vpack.c.bf16 %v242_v20, %v241_v19 }
  0x1a   : > { %795 = vmatpush3.bf16.msra.mxu0 %v794_v62  ;;  %v256_v17 = vld [vmem:[%s1319_s1 + $0x168] sm:$0xff]  ;;  %v274_v23 = vld [vmem:[%s1319_s1 + $0x1f8] sm:$0xff]  ;;  %448 = vmatprep.mubr.f32.mxu1 %v208_v21  ;;  %v802_v24 = vpack.c.bf16 %v224_v15, %v223_v11  ;;  %v225_v27 = vld [vmem:[%s1319_s1 + $0x70] sm:$0xff] }
  0x1b   : > { %797 = vmatprep.subr.bf16.mxu0 %v796_v0  ;;  %v834_v25 = vpack.c.bf16 %v256_v17, %v255_v16  ;;  %v226_v28 = vld [vmem:[%s1319_s1 + $0x78] sm:$0xff]  ;;  %v257_v29 = vld [vmem:[%s1319_s1 + $0x170] sm:$0xff]  ;;  %v836_v30 = vpack.c.bf16 %v274_v23, %v273_v22  ;;  %v291_v32 = vld [vmem:[%s1319_s1 + $0x280] sm:$0xff] }
  0x1c   : > { %827 = vmatpush3.bf16.msra.mxu1 %v826_v63  ;;  %v258_v31 = vld [vmem:[%s1319_s1 + $0x178] sm:$0xff]  ;;  %v292_v33 = vld [vmem:[%s1319_s1 + $0x288] sm:$0xff]  ;;  %v806_v34 = vpack.c.bf16 %v226_v28, %v225_v27  ;;  %v275_v37 = vld [vmem:[%s1319_s1 + $0x200] sm:$0xff] }
  0x1d   : > { %829 = vmatprep.subr.bf16.mxu1 %v828_v4  ;;  %v838_v35 = vpack.c.bf16 %v258_v31, %v257_v29  ;;  %v840_v36 = vpack.c.bf16 %v292_v33, %v291_v32  ;;  %v276_v38 = vld [vmem:[%s1319_s1 + $0x208] sm:$0xff]  ;;  %v293_v39 = vld [vmem:[%s1319_s1 + $0x290] sm:$0xff]  ;;  %v294_v40 = vld [vmem:[%s1319_s1 + $0x298] sm:$0xff] }
  0x1e   : > { %799 = vmatpush3.bf16.msra.mxu0 %v798_v10  ;;  %v205_v41 = vld [vmem:[%s1113_s21] sm:$0xff]  ;;  %v842_v42 = vpack.c.bf16 %v276_v38, %v275_v37  ;;  %v207_v43 = vld [vmem:[%s1113_s21 + $0x10] sm:$0xff]  ;;  %v844_v44 = vpack.c.bf16 %v294_v40, %v293_v39  ;;  %v278_v46 = vld [vmem:[%s1319_s1 + $0x218] sm:$0xff] }
  0x1f   : > { %801 = vmatprep.subr.bf16.mxu0 %v800_v14  ;;  %v277_v45 = vld [vmem:[%s1319_s1 + $0x210] sm:$0xff]  ;;  %v295_v47 = vld [vmem:[%s1319_s1 + $0x2a0] sm:$0xff]  ;;  %v296_v48 = vld [vmem:[%s1319_s1 + $0x2a8] sm:$0xff] }
  0x20   : > { %831 = vmatpush3.bf16.msra.mxu1 %v830_v13  ;;  %v210_v49 = vld [vmem:[%s1113_s21 + $0x28] sm:$0xff]  ;;  %v846_v50 = vpack.c.bf16 %v278_v46, %v277_v45  ;;  %v848_v51 = vpack.c.bf16 %v296_v48, %v295_v47  ;;  %v279_v52 = vld [vmem:[%s1319_s1 + $0x220] sm:$0xff]  ;;  %v297_v54 = vld [vmem:[%s1319_s1 + $0x2b0] sm:$0xff] }
  0x21   : > { %833 = vmatprep.subr.bf16.mxu1 %v832_v18  ;;  %v280_v53 = vld [vmem:[%s1319_s1 + $0x228] sm:$0xff]  ;;  %v298_v55 = vld [vmem:[%s1319_s1 + $0x2b8] sm:$0xff]  ;;  %v281_v58 = vld [vmem:[%s1319_s1 + $0x230] sm:$0xff] }
  0x22   : > { %803 = vmatpush3.bf16.msra.mxu0 %v802_v24  ;;  %v850_v56 = vpack.c.bf16 %v280_v53, %v279_v52  ;;  %v852_v57 = vpack.c.bf16 %v298_v55, %v297_v54  ;;  %v282_v59 = vld [vmem:[%s1319_s1 + $0x238] sm:$0xff]  ;;  %v299_v60 = vld [vmem:[%s1319_s1 + $0x2c0] sm:$0xff]  ;;  %v300_v61 = vld [vmem:[%s1319_s1 + $0x2c8] sm:$0xff] }
  0x23   : > { %805 = vmatprep.subr.bf16.mxu0 %v804_v26  ;;  %v854_v62 = vpack.c.bf16 %v282_v59, %v281_v58  ;;  %v856_v63 = vpack.c.bf16 %v300_v61, %v299_v60  ;;  %v283_v0 = vld [vmem:[%s1319_s1 + $0x240] sm:$0xff]  ;;  %v284_v1 = vld [vmem:[%s1319_s1 + $0x248] sm:$0xff]  ;;  %v301_v2 = vld [vmem:[%s1319_s1 + $0x2d0] sm:$0xff] }
  0x24   : > { %835 = vmatpush3.bf16.msra.mxu1 %v834_v25  ;;  %v302_v3 = vld [vmem:[%s1319_s1 + $0x2d8] sm:$0xff]  ;;  %v858_v4 = vpack.c.bf16 %v284_v1, %v283_v0  ;;  %v285_v6 = vld [vmem:[%s1319_s1 + $0x250] sm:$0xff]  ;;  %v303_v8 = vld [vmem:[%s1319_s1 + $0x2e0] sm:$0xff] }
  0x25   : > { %837 = vmatprep.subr.bf16.mxu1 %v836_v30  ;;  %v860_v5 = vpack.c.bf16 %v302_v3, %v301_v2  ;;  %v286_v7 = vld [vmem:[%s1319_s1 + $0x258] sm:$0xff]  ;;  %v304_v9 = vld [vmem:[%s1319_s1 + $0x2e8] sm:$0xff]  ;;  %v287_v12 = vld [vmem:[%s1319_s1 + $0x260] sm:$0xff] }
  0x26   : > { %807 = vmatpush3.bf16.msra.mxu0 %v806_v34  ;;  %v862_v10 = vpack.c.bf16 %v286_v7, %v285_v6  ;;  %v864_v11 = vpack.c.bf16 %v304_v9, %v303_v8  ;;  %v288_v13 = vld [vmem:[%s1319_s1 + $0x268] sm:$0xff]  ;;  %v305_v14 = vld [vmem:[%s1319_s1 + $0x2f0] sm:$0xff]  ;;  %v306_v15 = vld [vmem:[%s1319_s1 + $0x2f8] sm:$0xff] }
  0x27   : > { %841 = vmatprep.subr.bf16.mxu0 %v840_v36  ;;  %v866_v16 = vpack.c.bf16 %v288_v13, %v287_v12  ;;  %v868_v17 = vpack.c.bf16 %v306_v15, %v305_v14  ;;  %v289_v18 = vld [vmem:[%s1319_s1 + $0x270] sm:$0xff]  ;;  %v290_v19 = vld [vmem:[%s1319_s1 + $0x278] sm:$0xff]  ;;  %v209_v21 = vld [vmem:[%s1113_s21 + $0x20] sm:$0xff]  ;;  %s670_s21 = sshll.u32 %s1327_s12, 7 }
  0x28   : > { %839 = vmatpush3.bf16.msra.mxu1 %v838_v35  ;;  %v870_v20 = vpack.c.bf16 %v290_v19, %v289_v18  ;;  %v667_v23 = vld [vmem:[%s1320_s2] ss:$0 sm:$0xff]  ;;  %s1275_s9 = scalar_lea.vmem %s1321_s3, %s670_s21 }
  0x29   : > { %379 = vmatmul.mubr.f32.vlgmr.msra.gmra.mrb[0].mxu0 %v205_v41 }
  0x2a   : > { %843 = vmatpush3.bf16.msra.mxu0 %v842_v42  ;;  %518 = vmatprep.mubr.f32.mxu0 %v210_v49 }
  0x2b   : > { %449 = vmatmul.mubr.f32.vlgmr.msra.gmra.mrb[0].mxu1 %v207_v43  ;;  %845 = vmatprep.subr.bf16.mxu0 %v844_v44 }
  0x2e   : > { %847 = vmatpush3.bf16.msra.mxu0 %v846_v50 }
  0x2f   : > { %849 = vmatprep.subr.bf16.mxu0 %v848_v51 }
  0x32   : > { %851 = vmatpush3.bf16.msra.mxu0 %v850_v56 }
  0x33   : > { %853 = vmatprep.subr.bf16.mxu0 %v852_v57 }
  0x36   : > { %855 = vmatpush3.bf16.msra.mxu0 %v854_v62 }
  0x37   : > { %857 = vmatprep.subr.bf16.mxu0 %v856_v63 }
  0x3a   : > { %859 = vmatpush3.bf16.msra.mxu0 %v858_v4 }
  0x3b   : > { %861 = vmatprep.subr.bf16.mxu0 %v860_v5 }
  0x3e   : > { %863 = vmatpush3.bf16.msra.mxu0 %v862_v10 }
  0x3f   : > { %865 = vmatprep.subr.bf16.mxu0 %v864_v11 }
  0x42   : > { %867 = vmatpush3.bf16.msra.mxu0 %v866_v16 }
  0x43   : > { %869 = vmatprep.subr.bf16.mxu0 %v868_v17 }
  0x46   : > { %871 = vmatpush3.bf16.msra.mxu0 %v870_v20 }
  0x49   : > { %519 = vmatmul.mubr.f32.vlgmr.msra.gmra.mrb[2].mxu0 %v209_v21 }
  0xfc   : > { %v703_v22 = vpop.f32.mrb[0].mxu0 }
  0xfd   : > { %v704_v24 = vpop.f32.mrb[1].mxu0 }
  0xfe   : > { %v738_v25 = vpop.f32.mrb[0].mxu1  ;;  %v705_v26 = vadd.f32 %v704_v24, %v703_v22 }
  0xff   : > { %v739_v27 = vpop.f32.mrb[1].mxu1 }
 0x100   : > { %v740_v28 = vadd.f32 %v739_v27, %v738_v25  ;;  %v381_v29 = vadd.f32 %v705_v26, %v667_v23 }
 0x102   : > { %v451_v30 = vadd.f32 %v740_v28, %v381_v29 }
 0x11c   : > { %v773_v31 = vpop.f32.mrb[2].mxu0 }
 0x11d   : > { %v774_v32 = vpop.f32.mrb[3].mxu0 }
 0x11e   : > { %v775_v33 = vadd.f32 %v774_v32, %v773_v31 }
 0x120   : > { %v521_v34 = vadd.f32 %v775_v33, %v451_v30 }
 0x122   : > { %524 = vxpose.xlu0.b32.start.end [1/1] (short) %v521_v34, 128 }
 0x1a2   : > { %v540_v35 = vpop.trf.xlu0 }
 0x1a3   : > { %557 = vst.msk [vmem:[%s1275_s9] sm:$0xff] %vm556_vm0, %v540_v35 }
 0x1a6   : > { %v541_v36 = vpop.trf.xlu0 }
 0x1a7   : > { %558 = vst.msk [vmem:[%s1275_s9 + $0x8] sm:$0xff] %vm556_vm0, %v541_v36 }
 0x1aa   : > { %v542_v37 = vpop.trf.xlu0 }
 0x1ab   : > { %559 = vst.msk [vmem:[%s1275_s9 + $0x10] sm:$0xff] %vm556_vm0, %v542_v37 }
 0x1ae   : > { %v543_v38 = vpop.trf.xlu0 }
 0x1af   : > { %560 = vst.msk [vmem:[%s1275_s9 + $0x18] sm:$0xff] %vm556_vm0, %v543_v38 }
 0x1b2   : > { %v544_v39 = vpop.trf.xlu0 }
 0x1b3   : > { %561 = vst.msk [vmem:[%s1275_s9 + $0x20] sm:$0xff] %vm556_vm0, %v544_v39 }
 0x1b6   : > { %v545_v40 = vpop.trf.xlu0 }
 0x1b7   : > { %562 = vst.msk [vmem:[%s1275_s9 + $0x28] sm:$0xff] %vm556_vm0, %v545_v40 }
 0x1ba   : > { %v546_v41 = vpop.trf.xlu0 }
 0x1bb   : > { %563 = vst.msk [vmem:[%s1275_s9 + $0x30] sm:$0xff] %vm556_vm0, %v546_v41 }
 0x1be   : > { %v547_v42 = vpop.trf.xlu0 }
 0x1bf   : > { %564 = vst.msk [vmem:[%s1275_s9 + $0x38] sm:$0xff] %vm556_vm0, %v547_v42 }
 0x1c2   : > { %v548_v43 = vpop.trf.xlu0 }
 0x1c3   : > { %565 = vst.msk [vmem:[%s1275_s9 + $0x40] sm:$0xff] %vm556_vm0, %v548_v43 }
 0x1c6   : > { %v549_v44 = vpop.trf.xlu0 }
 0x1c7   : > { %566 = vst.msk [vmem:[%s1275_s9 + $0x48] sm:$0xff] %vm556_vm0, %v549_v44 }
 0x1ca   : > { %v550_v45 = vpop.trf.xlu0 }
 0x1cb   : > { %567 = vst.msk [vmem:[%s1275_s9 + $0x50] sm:$0xff] %vm556_vm0, %v550_v45 }
 0x1ce   : > { %v551_v46 = vpop.trf.xlu0 }
 0x1cf   : > { %568 = vst.msk [vmem:[%s1275_s9 + $0x58] sm:$0xff] %vm556_vm0, %v551_v46 }
 0x1d2   : > { %v552_v47 = vpop.trf.xlu0 }
 0x1d3   : > { %569 = vst.msk [vmem:[%s1275_s9 + $0x60] sm:$0xff] %vm556_vm0, %v552_v47 }
 0x1d6   : > { %v553_v48 = vpop.trf.xlu0 }
 0x1d7   : > { %570 = vst.msk [vmem:[%s1275_s9 + $0x68] sm:$0xff] %vm556_vm0, %v553_v48 }
 0x1da   : > { %v554_v49 = vpop.trf.xlu0 }
 0x1db   : > { %571 = vst.msk [vmem:[%s1275_s9 + $0x70] sm:$0xff] %vm556_vm0, %v554_v49 }
 0x1de   : > { %v555_v50 = vpop.trf.xlu0 }
 0x1df   : > { %572 = vst.msk [vmem:[%s1275_s9 + $0x78] sm:$0xff] %vm556_vm0, %v555_v50 }
 0x1e0 PF: > { %s13_s14 = sadd.s32 1, %s920_s14   ;;  %s1322_s12 = smov %s916_s13 }
 0x1e1   : > { %p10_p5 = scmp.ge.s32.totalorder %s13_s14, 4   ;;  %s1323_s13 = smov %s1325_s15 }
 0x1e3   :  { %12 = sbr.rel (!%p10_p5) target bundleno = 2 (0x2), region = 62 }

</bundles_post_ra>
